<compile_context>
chip_gen: v6e
topology: v6e:2x2x1
jax: 0.10.0
libtpu: 0.0.40
codegen_flags: <defaults>
</compile_context>

<pallas_src>
import functools

import jax
import jax.numpy as jnp
from jax.experimental import pallas as pl
from jax.experimental.pallas import tpu as pltpu


def _round_up(x, m):
    return ((x + m - 1) // m) * m


def _encode_bce_kernel(p_ref, t_ref, w_ref, o_ref, *, b_true, tile_b, tiles_per_split):
    """Fused sigmoid + weighted BCE, accumulated into a resident (1, 1, C) output block.

    p_ref : (tile_b, C) logits tile
    t_ref : (tile_b, C) target tile
    w_ref : (1, C) per-class weights (resident across the grid)
    o_ref : (1, 1, C) per-split partial per-class sums (resident across the reduction axis)
    """
    s = pl.program_id(0)          # parallel split (core) axis
    i = pl.program_id(1)          # batch-tile reduction axis ("arbitrary")

    @pl.when(i == 0)
    def _():
        o_ref[...] = jnp.zeros_like(o_ref)

    x = p_ref[...]
    if x.dtype != jnp.float32:
        x = x.astype(jnp.float32)
    t = t_ref[...]
    if t.dtype != jnp.float32:
        t = t.astype(jnp.float32)
    w = w_ref[...]                 # (1, C) -> broadcasts over the batch (sublane) axis

    p = jax.nn.sigmoid(x)
    # PyTorch BCELoss clamps each log term at -100.
    log_p = jnp.maximum(jnp.log(p), -100.0)
    log_1mp = jnp.maximum(jnp.log(1.0 - p), -100.0)
    elem = -w * (t * log_p + (1.0 - t) * log_1mp)          # (tile_b, C)

    # Mask padded batch rows (beyond the true B) so the padded tail contributes 0.
    row0 = (s * tiles_per_split + i) * tile_b
    rows = row0 + jax.lax.broadcasted_iota(jnp.int32, (tile_b, 1), 0)
    elem = jnp.where(rows < b_true, elem, 0.0)

    partial = jnp.sum(elem, axis=0, keepdims=True)          # (1, C) per-class tile sum
    o_ref[...] += partial[None]                              # (1, 1, C)


def encode_loss(preds, targets, weight=None, reduction="mean", tile_b=None):
    """JAX/Pallas equivalent of EncodeLoss.forward for 2-D targets.

    preds   : (B, C) float logits
    targets : (B, C) float presence vectors (0/1)
    weight  : optional (C,) per-class weights
    """
    assert preds.ndim == 2 and preds.shape == targets.shape
    if reduction not in ("mean", "sum"):
        raise ValueError(f"unsupported reduction: {reduction}")
    B, C = preds.shape

    if weight is None:
        weight = jnp.ones((C,), dtype=jnp.float32)
    weight = jnp.asarray(weight, dtype=jnp.float32).reshape(1, C)

    # --- tile selection: batch axis tiled, class axis full / lane-dense ---------------------
    in_bytes_per_row = C * (preds.dtype.itemsize + targets.dtype.itemsize)
    vmem_budget = 24 * (1 << 20)                       # for the 2x double-buffered input tiles
    max_tile_b = max(8, (vmem_budget // (2 * in_bytes_per_row)) // 8 * 8)
    if tile_b is None:
        tile_b = min(512, _round_up(B, 8), max_tile_b)
    else:
        tile_b = min(max(8, (tile_b // 8) * 8), _round_up(B, 8))
    tile_b = int(tile_b)

    n_tiles = -(-B // tile_b)
    n_split = 2 if n_tiles >= 2 else 1                 # engages both TCs on v7x; harmless elsewhere
    tiles_per_split = -(-n_tiles // n_split)
    b_pad = n_split * tiles_per_split * tile_b

    if b_pad != B:
        pad = ((0, b_pad - B), (0, 0))
        preds = jnp.pad(preds, pad)                    # padded rows are masked in-kernel
        targets = jnp.pad(targets, pad)

    kernel = functools.partial(
        _encode_bce_kernel, b_true=B, tile_b=tile_b, tiles_per_split=tiles_per_split
    )

    data_map = lambda s, i: (s * tiles_per_split + i, 0)

    partials = pl.pallas_call(
        kernel,
        out_shape=jax.ShapeDtypeStruct((n_split, 1, C), jnp.float32),
        grid=(n_split, tiles_per_split),
        in_specs=[
            pl.BlockSpec((tile_b, C), data_map),
            pl.BlockSpec((tile_b, C), data_map),
            pl.BlockSpec((1, C), lambda s, i: (0, 0)),      # weight stays resident
        ],
        out_specs=pl.BlockSpec((1, 1, C), lambda s, i: (s, 0, 0)),
        compiler_params=pltpu.CompilerParams(
            dimension_semantics=("parallel", "arbitrary"),
            vmem_limit_bytes=40 * (1 << 20),
        ),
    )(preds, targets, weight)

    total = jnp.sum(partials)
    if reduction == "mean":
        total = total / float(B * C)                   # true element count, not the padded one
    return total


def _reference(preds, targets, weight, reduction="mean"):
    """Plain-JAX reference mirroring torch.nn.BCELoss(weight)(sigmoid(preds), targets)."""
    p = jax.nn.sigmoid(preds.astype(jnp.float32))
    t = targets.astype(jnp.float32)
    w = weight.reshape(1, -1).astype(jnp.float32)
    elem = -w * (t * jnp.maximum(jnp.log(p), -100.0)
                 + (1.0 - t) * jnp.maximum(jnp.log(1.0 - p), -100.0))
    return jnp.mean(elem) if reduction == "mean" else jnp.sum(elem)


if __name__ == "__main__":
    key = jax.random.PRNGKey(0)
    k_pred, k_tgt, k_pred2, k_tgt2 = jax.random.split(key, 4)

    # --- test 1: tiny single-tile case (B=2, C=16) ------------------------------------------
    B, NUM_CLASSES = 2, 16
    preds = jax.random.normal(k_pred, (B, NUM_CLASSES), dtype=jnp.float32)
    targets = jax.random.bernoulli(k_tgt, p=0.5, shape=(B, NUM_CLASSES)).astype(jnp.float32)
    weight = jnp.linspace(0.5, 1.5, NUM_CLASSES, dtype=jnp.float32)

    loss = jax.block_until_ready(encode_loss(preds, targets, weight=weight, reduction="mean"))
    ref = _reference(preds, targets, weight, reduction="mean")
    assert jnp.allclose(loss, ref, rtol=1e-5, atol=1e-6), (loss, ref)

    # --- test 2: multi-tile + 2-way parallel split + padded-row masking (B=37, tile_b=8) ----
    B2, C2 = 37, 16
    preds2 = jax.random.normal(k_pred2, (B2, C2), dtype=jnp.float32)
    targets2 = jax.random.bernoulli(k_tgt2, p=0.5, shape=(B2, C2)).astype(jnp.float32)
    weight2 = jnp.linspace(0.25, 2.0, C2, dtype=jnp.float32)

    loss2 = jax.block_until_ready(
        encode_loss(preds2, targets2, weight=weight2, reduction="mean", tile_b=8))
    ref2 = _reference(preds2, targets2, weight2, reduction="mean")
    assert jnp.allclose(loss2, ref2, rtol=1e-5, atol=1e-6), (loss2, ref2)

    loss3 = jax.block_until_ready(
        encode_loss(preds2, targets2, weight=weight2, reduction="sum", tile_b=8))
    ref3 = _reference(preds2, targets2, weight2, reduction="sum")
    assert jnp.allclose(loss3, ref3, rtol=1e-5, atol=1e-5), (loss3, ref3)

    print("KERNEL_OK")
</pallas_src>

<mosaic_0001>
module attributes {stable_mosaic.version = 11 : i64} {
  func.func @_encode_bce_kernel(%arg0: i32, %arg1: i32, %arg2: memref<8x16xf32, #tpu.memory_space<vmem>>, %arg3: memref<8x16xf32, #tpu.memory_space<vmem>>, %arg4: memref<1x16xf32, #tpu.memory_space<vmem>>, %arg5: memref<1x1x16xf32, #tpu.memory_space<vmem>>) attributes {dimension_semantics = [#tpu.dimension_semantics<parallel>, #tpu.dimension_semantics<arbitrary>], iteration_bounds = array<i64: 1, 1>, scalar_prefetch = 0 : i64, scratch_operands = 0 : i64, tpu.core_type = #tpu.core_type<tc>, window_params = [{transform_indices = @transform_0, window_bounds = array<i64: 8, 16>}, {transform_indices = @transform_1, window_bounds = array<i64: 8, 16>}, {pipeline_mode = #tpu.pipeline_mode<synchronous>, transform_indices = @transform_2, window_bounds = array<i64: 1, 16>}, {transform_indices = @transform_3, window_bounds = array<i64: 1, 1, 16>}]} {
    %c0_i32 = arith.constant 0 : i32
    %0 = arith.cmpi eq, %arg1, %c0_i32 : i32
    %1 = arith.extui %0 : i1 to i32
    %c0_i32_0 = arith.constant 0 : i32
    %2 = arith.cmpi ne, %1, %c0_i32_0 : i32
    scf.if %2 {
      %cst_19 = arith.constant 0.000000e+00 : f32
      %46 = vector.broadcast %cst_19 : f32 to vector<1x1x16xf32>
      %c0_20 = arith.constant 0 : index
      %c0_21 = arith.constant 0 : index
      %c0_22 = arith.constant 0 : index
      %47 = vector.load %arg5[%c0_20, %c0_21, %c0_22] : memref<1x1x16xf32, #tpu.memory_space<vmem>>, vector<1x1x16xf32>
      tpu.vector_store %arg5[%c0_20, %c0_21, %c0_22], %46 {strides = array<i32>} : memref<1x1x16xf32, #tpu.memory_space<vmem>>, vector<1x1x16xf32>,
    } else {
    }
    %c0 = arith.constant 0 : index
    %c0_1 = arith.constant 0 : index
    %3 = vector.load %arg2[%c0, %c0_1] : memref<8x16xf32, #tpu.memory_space<vmem>>, vector<8x16xf32>
    %c0_2 = arith.constant 0 : index
    %c0_3 = arith.constant 0 : index
    %4 = vector.load %arg3[%c0_2, %c0_3] : memref<8x16xf32, #tpu.memory_space<vmem>>, vector<8x16xf32>
    %c0_4 = arith.constant 0 : index
    %c0_5 = arith.constant 0 : index
    %5 = vector.load %arg4[%c0_4, %c0_5] : memref<1x16xf32, #tpu.memory_space<vmem>>, vector<1x16xf32>
    %6 = arith.negf %3 : vector<8x16xf32>
    %7 = math.exp %6 : vector<8x16xf32>
    %cst = arith.constant 1.000000e+00 : f32
    %8 = vector.broadcast %cst : f32 to vector<8x16xf32>
    %9 = arith.addf %8, %7 : vector<8x16xf32>
    %10 = arith.divf %8, %9 : vector<8x16xf32>
    %11 = math.log %10 : vector<8x16xf32>
    %cst_6 = arith.constant -1.000000e+02 : f32
    %12 = vector.broadcast %cst_6 : f32 to vector<8x16xf32>
    %13 = arith.maximumf %11, %12 : vector<8x16xf32>
    %cst_7 = arith.constant 1.000000e+00 : f32
    %14 = vector.broadcast %cst_7 : f32 to vector<8x16xf32>
    %15 = arith.subf %14, %10 : vector<8x16xf32>
    %16 = math.log %15 : vector<8x16xf32>
    %cst_8 = arith.constant -1.000000e+02 : f32
    %17 = vector.broadcast %cst_8 : f32 to vector<8x16xf32>
    %18 = arith.maximumf %16, %17 : vector<8x16xf32>
    %cst_9 = arith.constant 0.000000e+00 : f32
    %19 = vector.broadcast %cst_9 : f32 to vector<1x16xf32>
    %20 = arith.subf %19, %5 : vector<1x16xf32>
    %21 = arith.mulf %4, %13 : vector<8x16xf32>
    %cst_10 = arith.constant 1.000000e+00 : f32
    %22 = vector.broadcast %cst_10 : f32 to vector<8x16xf32>
    %23 = arith.subf %22, %4 : vector<8x16xf32>
    %24 = arith.mulf %23, %18 : vector<8x16xf32>
    %25 = arith.addf %21, %24 : vector<8x16xf32>
    %26 = vector.broadcast %20 : vector<1x16xf32> to vector<8x16xf32>
    %27 = arith.mulf %26, %25 : vector<8x16xf32>
    %c1_i32 = arith.constant 1 : i32
    %28 = arith.muli %arg0, %c1_i32 : i32
    %29 = arith.addi %28, %arg1 : i32
    %c8_i32 = arith.constant 8 : i32
    %30 = arith.muli %29, %c8_i32 : i32
    %31 = tpu.iota {dimensions = array<i32: 0>} : vector<8x1xi32>
    %32 = vector.broadcast %30 : i32 to vector<8x1xi32>
    %33 = arith.addi %32, %31 : vector<8x1xi32>
    %c2_i32 = arith.constant 2 : i32
    %34 = vector.broadcast %c2_i32 : i32 to vector<8x1xi32>
    %35 = arith.cmpi slt, %33, %34 : vector<8x1xi32>
    %cst_11 = arith.constant 0.000000e+00 : f32
    %36 = vector.shape_cast %35 : vector<8x1xi1> to vector<8x1xi1>
    %37 = vector.broadcast %36 : vector<8x1xi1> to vector<8x16xi1>
    %38 = vector.broadcast %cst_11 : f32 to vector<8x16xf32>
    %39 = arith.select %37, %27, %38 : vector<8x16xi1>, vector<8x16xf32>
    %cst_12 = arith.constant dense<0.000000e+00> : vector<16xf32>
    %40 = vector.multi_reduction <add>, %39, %cst_12 [0] : vector<8x16xf32> to vector<16xf32>
    %41 = vector.shape_cast %40 : vector<16xf32> to vector<1x16xf32>
    %c0_13 = arith.constant 0 : index
    %c0_14 = arith.constant 0 : index
    %c0_15 = arith.constant 0 : index
    %42 = vector.load %arg5[%c0_13, %c0_14, %c0_15] : memref<1x1x16xf32, #tpu.memory_space<vmem>>, vector<1x1x16xf32>
    %43 = vector.shape_cast %41 : vector<1x16xf32> to vector<1x1x16xf32>
    %44 = arith.addf %42, %43 : vector<1x1x16xf32>
    %c0_16 = arith.constant 0 : index
    %c0_17 = arith.constant 0 : index
    %c0_18 = arith.constant 0 : index
    %45 = vector.load %arg5[%c0_16, %c0_17, %c0_18] : memref<1x1x16xf32, #tpu.memory_space<vmem>>, vector<1x1x16xf32>
    tpu.vector_store %arg5[%c0_16, %c0_17, %c0_18], %44 {strides = array<i32>} : memref<1x1x16xf32, #tpu.memory_space<vmem>>, vector<1x1x16xf32>,
    return
  }
  func.func @transform_0(%arg0: i32, %arg1: i32) -> (i32, i32) {
    %c1_i32 = arith.constant 1 : i32
    %0 = arith.muli %arg0, %c1_i32 : i32
    %1 = arith.addi %0, %arg1 : i32
    %c0_i32 = arith.constant 0 : i32
    %c0_i32_0 = arith.constant 0 : i32
    return %1, %c0_i32 : i32, i32
  }
  func.func @transform_1(%arg0: i32, %arg1: i32) -> (i32, i32) {
    %c1_i32 = arith.constant 1 : i32
    %0 = arith.muli %arg0, %c1_i32 : i32
    %1 = arith.addi %0, %arg1 : i32
    %c0_i32 = arith.constant 0 : i32
    %c0_i32_0 = arith.constant 0 : i32
    return %1, %c0_i32 : i32, i32
  }
  func.func @transform_2(%arg0: i32, %arg1: i32) -> (i32, i32) {
    %c0_i32 = arith.constant 0 : i32
    %c0_i32_0 = arith.constant 0 : i32
    %c0_i32_1 = arith.constant 0 : i32
    return %c0_i32, %c0_i32_0 : i32, i32
  }
  func.func @transform_3(%arg0: i32, %arg1: i32) -> (i32, i32, i32) {
    %c0_i32 = arith.constant 0 : i32
    %c0_i32_0 = arith.constant 0 : i32
    %c0_i32_1 = arith.constant 0 : i32
    return %arg0, %c0_i32, %c0_i32_0 : i32, i32, i32
  }
}

</mosaic_0001>

<bundles_post_ra>
// kernel: tpu_custom_call.1
= control target key start
LH: loop header
LB: loop body
LE: loop exit
PB: predicated region body
PF: predicated region fallthrough
CT: control target
= control target key end

     0   :  { %8 = vsyncpa [#allocation3], 0  ;;  %s236_s0 = inlined_call_operand.hbm [shape: f32[8,16], index: 0, kind: input, shape index: {}]   ;;  %s237_s1 = inlined_call_operand.hbm [shape: f32[8,16], index: 1, kind: input, shape index: {}]   ;;  %s238_s2 = inlined_call_operand.vmem [shape: f32[1,16], index: 2, kind: input, shape index: {}]   ;;  %s239_s3 = inlined_call_operand.hbm [shape: f32[1,1,16], index: 3, kind: output, shape index: {}]  }
   0x1   :  { %9 = vsyncpa [#allocation6], 0 }
   0x2   :  { %10 = vsyncpa [#allocation4], 0  ;;  %s198_s12 = smov [#allocation2]   ;;  %s199_s14 = smov [#allocation5]  }
   0x3   :  { %s20_s13 = sshll.u32 %s198_s12, 4  ;;  %s33_s15 = sshll.u32 %s199_s14, 4  ;;  %s21_s13 = int_to_ptr.vmem [resolvable:$true] %s20_s13  ;;  %s34_s15 = int_to_ptr.vmem [resolvable:$true] %s33_s15 }
   0x4   :  { %s140_s16 = scalar_lea.vmem %s21_s13, 128  ;;  %p145_p1 = scmp.lt.s32.totalorder %s21_s13, %s21_s13 }
   0x5   :  { %p141_p0 = scmp.ne.s32.totalorder %s21_s13, %s140_s16  ;;  %p146_p2 = scmp.lt.s32.totalorder %s140_s16, %s140_s16 }
   0x7   :  { %p147_p3 = por %p146_p2, %p145_p1 }
   0x9   :  { %p148_p4 = pnand %p147_p3, %p141_p0 }
   0xb   :  { %151 = shalt.err (!%p148_p4)
}
   0xc   :  { %23 = dma.hbm_to_vmem [thread:$0]  %s236_s0, 128, %s21_s13, [#allocation3]  }
   0xd   :  { %s160_s19 = scalar_lea.vmem %s34_s15, 128  ;;  %p165_p6 = scmp.lt.s32.totalorder %s34_s15, %s34_s15 }
   0xe   :  { %p161_p5 = scmp.ne.s32.totalorder %s34_s15, %s160_s19  ;;  %p166_p7 = scmp.lt.s32.totalorder %s160_s19, %s160_s19 }
  0x10   :  { %p167_p8 = por %p166_p7, %p165_p6 }
  0x12   :  { %p168_p9 = pnand %p167_p8, %p161_p5 }
  0x14   :  { %171 = shalt.err (!%p168_p9)
}
  0x15   :  { %36 = dma.hbm_to_vmem [thread:$0]  %s237_s1, 128, %s34_s15, [#allocation6]  }
  0x16   :  { %192 = dma.done.wait [#allocation3], 128  }
  0x17   :  { %193 = vsyncadd [#allocation3], 4294967168 }
  0x18   :  { %194 = dma.done.wait [#allocation6], 128  }
  0x19   :  { %195 = vsyncadd [#allocation6], 4294967168  ;;  %vm51_vm0 = vcmask 122880   ;;  %v200_v0 = vmov 0.0   ;;  %v53_v1 = vld [vmem:[#allocation2] sm:$0xff]  ;;  %v75_v7 = vlaneseq  ;;  %v54_v10 = vld [vmem:[#allocation5] sm:$0xff] }
  0x1a   :  { %52 = vst.msk [vmem:[#allocation7] sm:$0x1] %vm51_vm0, %v200_v0  ;;  %v119_v2 = vmul.f32 -1.442695, %v53_v1  ;;  %v55_v11 = vld [vmem:[%s238_s2] sm:$0x1] }
  0x1b   :  { %v76_v8 = vshrl.u32 %v75_v7, 7  ;;  %v69_v17 = vsub.f32 0.0, %v55_v11  ;;  %v71_v18 = vsub.f32 1.0, %v54_v10  ;;  %vm91_vm2 = vcmask 130048   ;;  %s201_s2 = smov [#allocation7]  }
  0x1c   :  { %124 = vpow2.f32 %v119_v2  ;;  %s109_s22 = sshll.u32 %s201_s2, 4  ;;  %s110_s22 = int_to_ptr.vmem [resolvable:$true] %s109_s22 }
  0x1d   :  { %v77_v14 = vsub.s32 0, %v76_v8  ;;  %vm87_vm1 = vcmp.lt.s32.totalorder %v76_v8, 2  ;;  %s172_s23 = scalar_lea.vmem %s110_s22, 16  ;;  %s176_s24 = scalar_lea.vmem %s110_s22, 32 }
  0x1e   :  { %p173_p10 = scmp.ne.s32.totalorder %s110_s22, %s172_s23  ;;  %p177_p11 = scmp.lt.s32.totalorder %s110_s22, %s110_s22 }
  0x1f   :  { %v78_v22 = vrot.slane %v69_v17, %v77_v14  ;;  %p178_p12 = scmp.lt.s32.totalorder %s176_s24, %s172_s23 }
  0x21   :  { %v99_v32 = vld [vmem:[#allocation7] sm:$0x1]  ;;  %p179_p13 = por %p178_p12, %p177_p11 }
  0x23   :  { %p180_p0 = pnand %p179_p13, %p173_p10 }
  0x29   :  { %v125_v3 = vpop.eup %124 }
  0x2a   :  { %v59_v4 = vadd.f32 1.0, %v125_v3 }
  0x2c   :  { %126 = vrcp.f32 %v59_v4 }
  0x39   :  { %v127_v5 = vpop.eup %126 }
  0x3a   :  { %128 = vlog2.f32 %v127_v5  ;;  %v65_v6 = vsub.f32 1.0, %v127_v5 }
  0x3c   :  { %130 = vlog2.f32 %v65_v6 }
  0x47   :  { %v129_v9 = vpop.eup %128 }
  0x48   :  { %v63_v12 = vmul.f32 0.6931472, %v129_v9 }
  0x49   :  { %v131_v13 = vpop.eup %130 }
  0x4a   :  { %v64_v15 = vmax.f32 %v63_v12, -100.0  ;;  %v67_v16 = vmul.f32 0.6931472, %v131_v13 }
  0x4c   :  { %v68_v19 = vmax.f32 %v67_v16, -100.0  ;;  %v70_v20 = vmul.f32 %v64_v15, %v54_v10 }
  0x4e   :  { %v72_v21 = vmul.f32 %v71_v18, %v68_v19 }
  0x50   :  { %v73_v23 = vadd.f32 %v72_v21, %v70_v20 }
  0x52   :  { %v80_v24 = vmul.f32 %v78_v22, %v73_v23 }
  0x54   :  { %v90_v25 = vsel %vm87_vm1, %v80_v24, 0.0 }
  0x55   :  { %v92_v26 = vsel %vm91_vm2, %v90_v25, 0.0 }
  0x56   :  { %v93_v27 = vrot.slane %v92_v26, 4 }
  0x58   :  { %v94_v28 = vadd.f32 %v93_v27, %v92_v26 }
  0x5a   :  { %v95_v29 = vrot.slane %v94_v28, 2 }
  0x5c   :  { %v96_v30 = vadd.f32 %v95_v29, %v94_v28 }
  0x5e   :  { %v97_v31 = vrot.slane %v96_v30, 1 }
  0x60   :  { %v98_v33 = vadd.f32 %v97_v31, %v96_v30 }
  0x62   :  { %v100_v34 = vadd.f32 %v99_v32, %v98_v33 }
  0x64   :  { %102 = vst.msk [vmem:[#allocation7] sm:$0x1] %vm51_vm0, %v100_v34 }
  0x65   :  { %183 = shalt.err (!%p180_p0)
}
  0x66   :  { %112 = dma.vmem_to_hbm [thread:$0]  %s110_s22, 16, %s239_s3, [#allocation4]  }
  0x67   :  { %196 = dma.done.wait [#allocation4], 16  }
  0x68   :  { %197 = vsyncadd [#allocation4], 4294967280 }
  0x69   :  { %116 = vsyncpa [#allocation3], 1 }
  0x6a   :  { %117 = vsyncpa [#allocation6], 1 }
  0x6b   :  { %118 = vsyncpa [#allocation4], 1 }

</bundles_post_ra>
